<compile_context>
chip_gen: v7x
topology: tpu7x:2x2x1
jax: 0.10.0
libtpu: 0.0.40
codegen_flags: <defaults>
</compile_context>

<pallas_src>
import jax
import jax.numpy as jnp
import numpy as np
from jax.experimental import pallas as pl
from jax.experimental.pallas import tpu as pltpu


def _round_up(x, m):
    return ((x + m - 1) // m) * m


def _bilinear_kernel(s_ref, q_ref, w2t_ref, wcol_ref, b_ref, o_ref):
    # s_ref, q_ref : [D, tm]    bf16   feature-major activation tiles
    # w2t_ref      : [R*D, D]   bf16   fused bilinear weight (VMEM resident)
    # wcol_ref     : [R]        f32    linear_out weight (SMEM scalars)
    # b_ref        : [1]        f32    linear_out bias   (SMEM scalar)
    # o_ref        : [1, 1, tm] f32    lane-dense output block
    D, tm = s_ref.shape
    R = wcol_ref.shape[0]

    # Single fused MXU matmul: [R*D, D] @ [D, tm] -> [R*D, tm], f32 accumulate.
    t = jnp.dot(w2t_ref[...], s_ref[...], preferred_element_type=jnp.float32)

    q = q_ref[...].astype(jnp.float32)                      # [D, tm]

    # Per-relation segmented reduce + ReLU + linear_out, all on VPU/XLU.
    # Static unroll over R (small); slices are whole-sublane-group views.
    acc = jnp.zeros((1, tm), jnp.float32)
    for r in range(R):
        seg = t[r * D:(r + 1) * D, :] * q                   # [D, tm]  f32 (VPU)
        rel_r = jnp.sum(seg, axis=0, keepdims=True)         # [1, tm]  sublane reduce
        rel_r = jnp.maximum(rel_r, 0.0)                     # ReLU
        acc = acc + wcol_ref[r] * rel_r                     # SMEM-scalar weighting

    logits = acc + b_ref[0]
    o_ref[...] = jax.nn.sigmoid(logits).reshape(o_ref.shape).astype(o_ref.dtype)


def _choose_tile(M, tm_req):
    """Lane-aligned row tile; at least 2 tiles when M > 128 (v7x has 2 TCs)."""
    if M <= 128:
        return M, 1                      # single block == full dim (tiny path)
    tm = max(128, min(_round_up(tm_req, 128), _round_up(M, 128)))
    n = pl.cdiv(M, tm)
    if n < 2:
        tm = _round_up(pl.cdiv(M, 2), 128)
        n = pl.cdiv(M, tm)
    return tm, n


def bilinear_relation(support, query, w_bil, w_out, b_out, *, tm=1024):
    """support/query: [B, totalQ, N, D] -> relation score [B, totalQ, N]."""
    B, TQ, N, D = support.shape
    R = w_bil.shape[0]
    M = B * TQ * N

    tm, num_tiles = _choose_tile(M, tm)

    # Feature-major bf16 activations (transpose + cast fuse into one pass).
    # No jnp.pad: Pallas pads the ragged last block; tail columns are sliced.
    s2t = support.reshape(M, D).T.astype(jnp.bfloat16)       # [D, M]
    q2t = query.reshape(M, D).T.astype(jnp.bfloat16)         # [D, M]

    # Fused bilinear weight: W2T[r*D + e, d] = w_bil[r, d, e]  -> [R*D, D]
    w2t = jnp.transpose(w_bil, (0, 2, 1)).reshape(R * D, D).astype(jnp.bfloat16)
    wcol = w_out.reshape(R).astype(jnp.float32)               # SMEM scalars
    b2 = b_out.reshape(1).astype(jnp.float32)                 # SMEM scalar

    cost = pl.CostEstimate(
        flops=int(M) * (2 * D * R * D + 2 * R * D + 3 * R),
        transcendentals=int(M),
        bytes_accessed=int(2 * M * D * 2 + R * D * D * 2 + num_tiles * tm * 4),
    )

    out = pl.pallas_call(
        _bilinear_kernel,
        out_shape=jax.ShapeDtypeStruct((num_tiles, 1, tm), jnp.float32),
        grid_spec=pltpu.PrefetchScalarGridSpec(
            num_scalar_prefetch=0,
            grid=(num_tiles,),
            in_specs=[
                pl.BlockSpec((D, tm), lambda i: (0, i)),           # support (feat-major)
                pl.BlockSpec((D, tm), lambda i: (0, i)),           # query   (feat-major)
                pl.BlockSpec((R * D, D), lambda i: (0, 0)),        # fused W (resident)
                pl.BlockSpec(memory_space=pltpu.MemorySpace.SMEM),  # linear_out weight
                pl.BlockSpec(memory_space=pltpu.MemorySpace.SMEM),  # linear_out bias
            ],
            out_specs=pl.BlockSpec((1, 1, tm), lambda i: (i, 0, 0)),
        ),
        compiler_params=pltpu.CompilerParams(
            dimension_semantics=("parallel",)),
        cost_estimate=cost,
    )(s2t, q2t, w2t, wcol, b2)

    return out.reshape(num_tiles * tm)[:M].reshape(B, TQ, N)


def _init_params(key, hidden_size, relation_size):
    """Deterministic parameter init mirroring the PyTorch module's __init__."""
    k1, k2, k3 = jax.random.split(key, 3)
    D, R = hidden_size, relation_size

    # nn.Bilinear weight [R, D, D], kaiming_uniform_(nonlinearity='relu'):
    #   gain = sqrt(2), fan_in = D * D, bound = gain * sqrt(3 / fan_in)
    bound_bil = np.sqrt(2.0) * np.sqrt(3.0 / (D * D))
    w_bil = jax.random.uniform(k1, (R, D, D), jnp.float32,
                               minval=-bound_bil, maxval=bound_bil)

    # nn.Linear(relation_size, 1) weight [1, R], xavier_uniform_(gain=1):
    bound_out = np.sqrt(6.0 / (R + 1))
    w_out = jax.random.uniform(k2, (1, R), jnp.float32,
                               minval=-bound_out, maxval=bound_out)

    # nn.Linear default bias init: uniform(-1/sqrt(fan_in), 1/sqrt(fan_in))
    bound_b = 1.0 / np.sqrt(R)
    b_out = jax.random.uniform(k3, (1,), jnp.float32,
                               minval=-bound_b, maxval=bound_b)
    return w_bil, w_out, b_out


def _reference(support, query, w_bil, w_out, b_out):
    hp = jax.lax.Precision.HIGHEST
    rel = jnp.einsum('btni,rij,btnj->btnr', support, w_bil, query, precision=hp)
    rel = jax.nn.relu(rel)
    score = jax.nn.sigmoid(
        jnp.einsum('btnr,or->btno', rel, w_out, precision=hp) + b_out)
    return score[..., 0]


if __name__ == "__main__":
    B, TQ, N, D, R = 2, 4, 5, 32, 8   # M = B*TQ*N = 40 rows
    key = jax.random.PRNGKey(0)
    kp, ks, kq = jax.random.split(key, 3)

    w_bil, w_out, b_out = _init_params(kp, D, R)
    support = jax.random.normal(ks, (B, TQ, N, D), jnp.float32)
    query = jax.random.normal(kq, (B, TQ, N, D), jnp.float32)

    out = bilinear_relation(support, query, w_bil, w_out, b_out)
    out = jax.block_until_ready(out)

    ref = _reference(support, query, w_bil, w_out, b_out)
    # Tolerance covers bf16 streaming of activations/weights (f32 accumulate);
    # structural errors would be O(0.1) on the (0,1) sigmoid outputs.
    np.testing.assert_allclose(np.asarray(out), np.asarray(ref),
                               rtol=2e-2, atol=2e-2)
    assert out.shape == (B, TQ, N)
    print("KERNEL_OK")
</pallas_src>

<mosaic_0001>
module attributes {stable_mosaic.version = 11 : i64} {
  func.func @_bilinear_kernel(%arg0: i32, %arg1: memref<32x40xbf16, #tpu.memory_space<vmem>>, %arg2: memref<32x40xbf16, #tpu.memory_space<vmem>>, %arg3: memref<256x32xbf16, #tpu.memory_space<vmem>>, %arg4: memref<8xf32, #tpu.memory_space<smem>>, %arg5: memref<1xf32, #tpu.memory_space<smem>>, %arg6: memref<1x1x40xf32, #tpu.memory_space<vmem>>) attributes {dimension_semantics = [#tpu.dimension_semantics<parallel>], iteration_bounds = array<i64: 1>, scalar_prefetch = 0 : i64, scratch_operands = 0 : i64, tpu.core_type = #tpu.core_type<tc>, window_params = [{transform_indices = @transform_0, window_bounds = array<i64: 32, 40>}, {transform_indices = @transform_1, window_bounds = array<i64: 32, 40>}, {pipeline_mode = #tpu.pipeline_mode<synchronous>, transform_indices = @transform_2, window_bounds = array<i64: 256, 32>}, {transform_indices = @transform_3, window_bounds = array<i64: 8>}, {transform_indices = @transform_4, window_bounds = array<i64: 1>}, {transform_indices = @transform_5, window_bounds = array<i64: 1, 1, 40>}]} {
    %c0 = arith.constant 0 : index
    %c0_0 = arith.constant 0 : index
    %0 = vector.load %arg3[%c0, %c0_0] : memref<256x32xbf16, #tpu.memory_space<vmem>>, vector<256x32xbf16>
    %c0_1 = arith.constant 0 : index
    %c0_2 = arith.constant 0 : index
    %1 = vector.load %arg1[%c0_1, %c0_2] : memref<32x40xbf16, #tpu.memory_space<vmem>>, vector<32x40xbf16>
    %cst = arith.constant dense<0.000000e+00> : vector<256x40xf32>
    %2 = tpu.matmul %0, %1, %cst {dimension_numbers = #tpu.dot_dimension_numbers<[1], [0], [0], [1], [0, 0, 1, 1], [], []>} : vector<256x32xbf16>, vector<32x40xbf16>, vector<256x40xf32> -> vector<256x40xf32>
    %c0_3 = arith.constant 0 : index
    %c0_4 = arith.constant 0 : index
    %3 = vector.load %arg2[%c0_3, %c0_4] : memref<32x40xbf16, #tpu.memory_space<vmem>>, vector<32x40xbf16>
    %4 = arith.extf %3 : vector<32x40xbf16> to vector<32x40xf32>
    %cst_5 = arith.constant 0.000000e+00 : f32
    %5 = vector.broadcast %cst_5 : f32 to vector<1x40xf32>
    %6 = vector.extract_strided_slice %2 {offsets = [0, 0], sizes = [32, 40], strides = [1, 1]} : vector<256x40xf32> to vector<32x40xf32>
    %7 = arith.mulf %6, %4 : vector<32x40xf32>
    %cst_6 = arith.constant dense<0.000000e+00> : vector<40xf32>
    %8 = vector.multi_reduction <add>, %7, %cst_6 [0] : vector<32x40xf32> to vector<40xf32>
    %9 = vector.shape_cast %8 : vector<40xf32> to vector<1x40xf32>
    %cst_7 = arith.constant 0.000000e+00 : f32
    %10 = vector.broadcast %cst_7 : f32 to vector<1x40xf32>
    %11 = arith.maximumf %9, %10 : vector<1x40xf32>
    %c0_8 = arith.constant 0 : index
    %12 = memref.load %arg4[%c0_8] : memref<8xf32, #tpu.memory_space<smem>>
    %13 = vector.broadcast %12 : f32 to vector<1x40xf32>
    %14 = arith.mulf %13, %11 : vector<1x40xf32>
    %15 = arith.addf %5, %14 : vector<1x40xf32>
    %16 = vector.extract_strided_slice %2 {offsets = [32, 0], sizes = [32, 40], strides = [1, 1]} : vector<256x40xf32> to vector<32x40xf32>
    %17 = arith.mulf %16, %4 : vector<32x40xf32>
    %cst_9 = arith.constant dense<0.000000e+00> : vector<40xf32>
    %18 = vector.multi_reduction <add>, %17, %cst_9 [0] : vector<32x40xf32> to vector<40xf32>
    %19 = vector.shape_cast %18 : vector<40xf32> to vector<1x40xf32>
    %cst_10 = arith.constant 0.000000e+00 : f32
    %20 = vector.broadcast %cst_10 : f32 to vector<1x40xf32>
    %21 = arith.maximumf %19, %20 : vector<1x40xf32>
    %c1 = arith.constant 1 : index
    %22 = memref.load %arg4[%c1] : memref<8xf32, #tpu.memory_space<smem>>
    %23 = vector.broadcast %22 : f32 to vector<1x40xf32>
    %24 = arith.mulf %23, %21 : vector<1x40xf32>
    %25 = arith.addf %15, %24 : vector<1x40xf32>
    %26 = vector.extract_strided_slice %2 {offsets = [64, 0], sizes = [32, 40], strides = [1, 1]} : vector<256x40xf32> to vector<32x40xf32>
    %27 = arith.mulf %26, %4 : vector<32x40xf32>
    %cst_11 = arith.constant dense<0.000000e+00> : vector<40xf32>
    %28 = vector.multi_reduction <add>, %27, %cst_11 [0] : vector<32x40xf32> to vector<40xf32>
    %29 = vector.shape_cast %28 : vector<40xf32> to vector<1x40xf32>
    %cst_12 = arith.constant 0.000000e+00 : f32
    %30 = vector.broadcast %cst_12 : f32 to vector<1x40xf32>
    %31 = arith.maximumf %29, %30 : vector<1x40xf32>
    %c2 = arith.constant 2 : index
    %32 = memref.load %arg4[%c2] : memref<8xf32, #tpu.memory_space<smem>>
    %33 = vector.broadcast %32 : f32 to vector<1x40xf32>
    %34 = arith.mulf %33, %31 : vector<1x40xf32>
    %35 = arith.addf %25, %34 : vector<1x40xf32>
    %36 = vector.extract_strided_slice %2 {offsets = [96, 0], sizes = [32, 40], strides = [1, 1]} : vector<256x40xf32> to vector<32x40xf32>
    %37 = arith.mulf %36, %4 : vector<32x40xf32>
    %cst_13 = arith.constant dense<0.000000e+00> : vector<40xf32>
    %38 = vector.multi_reduction <add>, %37, %cst_13 [0] : vector<32x40xf32> to vector<40xf32>
    %39 = vector.shape_cast %38 : vector<40xf32> to vector<1x40xf32>
    %cst_14 = arith.constant 0.000000e+00 : f32
    %40 = vector.broadcast %cst_14 : f32 to vector<1x40xf32>
    %41 = arith.maximumf %39, %40 : vector<1x40xf32>
    %c3 = arith.constant 3 : index
    %42 = memref.load %arg4[%c3] : memref<8xf32, #tpu.memory_space<smem>>
    %43 = vector.broadcast %42 : f32 to vector<1x40xf32>
    %44 = arith.mulf %43, %41 : vector<1x40xf32>
    %45 = arith.addf %35, %44 : vector<1x40xf32>
    %46 = vector.extract_strided_slice %2 {offsets = [128, 0], sizes = [32, 40], strides = [1, 1]} : vector<256x40xf32> to vector<32x40xf32>
    %47 = arith.mulf %46, %4 : vector<32x40xf32>
    %cst_15 = arith.constant dense<0.000000e+00> : vector<40xf32>
    %48 = vector.multi_reduction <add>, %47, %cst_15 [0] : vector<32x40xf32> to vector<40xf32>
    %49 = vector.shape_cast %48 : vector<40xf32> to vector<1x40xf32>
    %cst_16 = arith.constant 0.000000e+00 : f32
    %50 = vector.broadcast %cst_16 : f32 to vector<1x40xf32>
    %51 = arith.maximumf %49, %50 : vector<1x40xf32>
    %c4 = arith.constant 4 : index
    %52 = memref.load %arg4[%c4] : memref<8xf32, #tpu.memory_space<smem>>
    %53 = vector.broadcast %52 : f32 to vector<1x40xf32>
    %54 = arith.mulf %53, %51 : vector<1x40xf32>
    %55 = arith.addf %45, %54 : vector<1x40xf32>
    %56 = vector.extract_strided_slice %2 {offsets = [160, 0], sizes = [32, 40], strides = [1, 1]} : vector<256x40xf32> to vector<32x40xf32>
    %57 = arith.mulf %56, %4 : vector<32x40xf32>
    %cst_17 = arith.constant dense<0.000000e+00> : vector<40xf32>
    %58 = vector.multi_reduction <add>, %57, %cst_17 [0] : vector<32x40xf32> to vector<40xf32>
    %59 = vector.shape_cast %58 : vector<40xf32> to vector<1x40xf32>
    %cst_18 = arith.constant 0.000000e+00 : f32
    %60 = vector.broadcast %cst_18 : f32 to vector<1x40xf32>
    %61 = arith.maximumf %59, %60 : vector<1x40xf32>
    %c5 = arith.constant 5 : index
    %62 = memref.load %arg4[%c5] : memref<8xf32, #tpu.memory_space<smem>>
    %63 = vector.broadcast %62 : f32 to vector<1x40xf32>
    %64 = arith.mulf %63, %61 : vector<1x40xf32>
    %65 = arith.addf %55, %64 : vector<1x40xf32>
    %66 = vector.extract_strided_slice %2 {offsets = [192, 0], sizes = [32, 40], strides = [1, 1]} : vector<256x40xf32> to vector<32x40xf32>
    %67 = arith.mulf %66, %4 : vector<32x40xf32>
    %cst_19 = arith.constant dense<0.000000e+00> : vector<40xf32>
    %68 = vector.multi_reduction <add>, %67, %cst_19 [0] : vector<32x40xf32> to vector<40xf32>
    %69 = vector.shape_cast %68 : vector<40xf32> to vector<1x40xf32>
    %cst_20 = arith.constant 0.000000e+00 : f32
    %70 = vector.broadcast %cst_20 : f32 to vector<1x40xf32>
    %71 = arith.maximumf %69, %70 : vector<1x40xf32>
    %c6 = arith.constant 6 : index
    %72 = memref.load %arg4[%c6] : memref<8xf32, #tpu.memory_space<smem>>
    %73 = vector.broadcast %72 : f32 to vector<1x40xf32>
    %74 = arith.mulf %73, %71 : vector<1x40xf32>
    %75 = arith.addf %65, %74 : vector<1x40xf32>
    %76 = vector.extract_strided_slice %2 {offsets = [224, 0], sizes = [32, 40], strides = [1, 1]} : vector<256x40xf32> to vector<32x40xf32>
    %77 = arith.mulf %76, %4 : vector<32x40xf32>
    %cst_21 = arith.constant dense<0.000000e+00> : vector<40xf32>
    %78 = vector.multi_reduction <add>, %77, %cst_21 [0] : vector<32x40xf32> to vector<40xf32>
    %79 = vector.shape_cast %78 : vector<40xf32> to vector<1x40xf32>
    %cst_22 = arith.constant 0.000000e+00 : f32
    %80 = vector.broadcast %cst_22 : f32 to vector<1x40xf32>
    %81 = arith.maximumf %79, %80 : vector<1x40xf32>
    %c7 = arith.constant 7 : index
    %82 = memref.load %arg4[%c7] : memref<8xf32, #tpu.memory_space<smem>>
    %83 = vector.broadcast %82 : f32 to vector<1x40xf32>
    %84 = arith.mulf %83, %81 : vector<1x40xf32>
    %85 = arith.addf %75, %84 : vector<1x40xf32>
    %c0_23 = arith.constant 0 : index
    %86 = memref.load %arg5[%c0_23] : memref<1xf32, #tpu.memory_space<smem>>
    %87 = vector.broadcast %86 : f32 to vector<1x40xf32>
    %88 = arith.addf %85, %87 : vector<1x40xf32>
    %89 = arith.negf %88 : vector<1x40xf32>
    %90 = math.exp %89 : vector<1x40xf32>
    %cst_24 = arith.constant 1.000000e+00 : f32
    %91 = vector.broadcast %cst_24 : f32 to vector<1x40xf32>
    %92 = arith.addf %91, %90 : vector<1x40xf32>
    %93 = arith.divf %91, %92 : vector<1x40xf32>
    %94 = vector.shape_cast %93 : vector<1x40xf32> to vector<1x1x40xf32>
    %c0_25 = arith.constant 0 : index
    %c0_26 = arith.constant 0 : index
    %c0_27 = arith.constant 0 : index
    %95 = vector.load %arg6[%c0_25, %c0_26, %c0_27] : memref<1x1x40xf32, #tpu.memory_space<vmem>>, vector<1x1x40xf32>
    tpu.vector_store %arg6[%c0_25, %c0_26, %c0_27], %94 {strides = array<i32>} : memref<1x1x40xf32, #tpu.memory_space<vmem>>, vector<1x1x40xf32>,
    return
  }
  func.func @transform_0(%arg0: i32) -> (i32, i32) {
    %c0_i32 = arith.constant 0 : i32
    %c0_i32_0 = arith.constant 0 : i32
    return %c0_i32, %arg0 : i32, i32
  }
  func.func @transform_1(%arg0: i32) -> (i32, i32) {
    %c0_i32 = arith.constant 0 : i32
    %c0_i32_0 = arith.constant 0 : i32
    return %c0_i32, %arg0 : i32, i32
  }
  func.func @transform_2(%arg0: i32) -> (i32, i32) {
    %c0_i32 = arith.constant 0 : i32
    %c0_i32_0 = arith.constant 0 : i32
    %c0_i32_1 = arith.constant 0 : i32
    return %c0_i32, %c0_i32_0 : i32, i32
  }
  func.func @transform_3(%arg0: i32) -> i32 {
    %c0_i32 = arith.constant 0 : i32
    %c0_i32_0 = arith.constant 0 : i32
    return %c0_i32 : i32
  }
  func.func @transform_4(%arg0: i32) -> i32 {
    %c0_i32 = arith.constant 0 : i32
    %c0_i32_0 = arith.constant 0 : i32
    return %c0_i32 : i32
  }
  func.func @transform_5(%arg0: i32) -> (i32, i32, i32) {
    %c0_i32 = arith.constant 0 : i32
    %c0_i32_0 = arith.constant 0 : i32
    %c0_i32_1 = arith.constant 0 : i32
    return %arg0, %c0_i32, %c0_i32_0 : i32, i32, i32
  }
}

</mosaic_0001>

<bundles_post_ra>
// kernel: tpu_custom_call.1
= control target key start
LH: loop header
LB: loop body
LE: loop exit
PB: predicated region body
PF: predicated region fallthrough
CT: control target
= control target key end

     0   :  { %11 = vsyncpa [#allocation5], 0  ;;  %s967_s0 = inlined_call_operand.vmem [shape: bf16[32,40], index: 0, kind: input, shape index: {}]   ;;  %s968_s1 = inlined_call_operand.vmem [shape: bf16[32,40], index: 1, kind: input, shape index: {}]   ;;  %s969_s2 = inlined_call_operand.vmem [shape: bf16[256,32], index: 2, kind: input, shape index: {}]   ;;  %s970_s3 = inlined_call_operand.vmem [shape: f32[8], index: 3, kind: input, shape index: {}]   ;;  %s971_s4 = inlined_call_operand.<no memory space> [shape: f32[1], index: 4, kind: input, shape index: {}]   ;;  %s972_s5 = inlined_call_operand.hbm [shape: f32[1,1,40], index: 5, kind: output, shape index: {}]  }
   0x1   :  { %12 = vsyncpa [#allocation4], 0  ;;  %s25_s20 = sshll.u32 %s970_s3, 4  ;;  %s26_s20 = int_to_ptr.vmem [resolvable:$true] %s25_s20 }
   0x2   :  { %s718_s21 = scalar_lea.vmem %s26_s20, 16  ;;  %p723_p1 = scmp.lt.s32.totalorder %s26_s20, %s26_s20 }
   0x3   :  { %p719_p0 = scmp.ne.s32.totalorder %s26_s20, %s718_s21  ;;  %p724_p2 = scmp.lt.s32.totalorder %s718_s21, %s718_s21 }
   0x5   :  { %p725_p3 = por %p724_p2, %p723_p1 }
   0x7   :  { %p726_p4 = pnand %p725_p3, %p719_p0 }
   0x9   :  { %729 = shalt.err (!%p726_p4)
}
   0xa   :  { %s756_s22 = smov [#allocation3]  }
   0xb   :  { %28 = dma.vmem_to_smem %s26_s20, 16, %s756_s22, [#allocation5]  }
   0xc   :  { %752 = dma.done.wait [#allocation5], 16  }
   0xd   :  { %753 = vsyncadd [#allocation5], 4294967280 }
   0xe   :  { %34 = sfence }
   0xf   :  { %v696_v0 = vld [vmem:[%s967_s0] sm:$0xff]   ;;  %v697_v1 = vld [vmem:[%s967_s0 + $0x8] sm:$0xff]   ;;  %vm164_vm0 = vcmask 261120   ;;  %v702_v6 = vld [vmem:[%s969_s2 + $0x10] sm:$0xff]   ;;  %vm386_vm1 = vcmask 326656   ;;  %s938_s9 = sld [smem:[#allocation3 + $0x2]] }
  0x10   :  { %654 = vmatprep.subr.bf16.mxu0 %v696_v0  ;;  %690 = vmatprep.subr.bf16.mxu1 %v696_v0  ;;  %v698_v2 = vld [vmem:[%s969_s2] sm:$0xff]   ;;  %v700_v4 = vld [vmem:[%s969_s2 + $0x8] sm:$0xff]   ;;  %v703_v7 = vld [vmem:[%s969_s2 + $0x50] sm:$0xff]   ;;  %s621_s10 = sld [smem:[#allocation3 + $0x3]]  ;;  %s622_s11 = sld [smem:[#allocation3 + $0x4]]  ;;  %vm568_vm2 = vcmask 319488  }
  0x11   :  { %655 = vmatpush3.bf16.msra.mxu0 %v696_v0  ;;  %692 = vmatpush3.bf16.msra.mxu1 %v696_v0  ;;  %v699_v3 = vld [vmem:[%s969_s2 + $0x40] sm:$0xff]   ;;  %v701_v5 = vld [vmem:[%s969_s2 + $0x48] sm:$0xff]   ;;  %v704_v8 = vld [vmem:[%s969_s2 + $0x18] sm:$0xff]   ;;  %s623_s12 = sld [smem:[#allocation3 + $0x5]]  ;;  %s624_s13 = sld [smem:[#allocation3 + $0x6]] }
  0x12   :  { %656 = vmatprep.subr.bf16.mxu0 %v697_v1  ;;  %691 = vmatprep.subr.bf16.mxu1 %v697_v1  ;;  %v705_v9 = vld [vmem:[%s969_s2 + $0x58] sm:$0xff]   ;;  %v706_v10 = vld [vmem:[%s969_s2 + $0x20] sm:$0xff]   ;;  %v708_v12 = vld [vmem:[%s969_s2 + $0x28] sm:$0xff]   ;;  %s625_s14 = sld [smem:[#allocation3 + $0x7]]  ;;  %s757_s17 = smov [#allocation6]  }
  0x13   :  { %658 = vmatprep.mubr.msk.bf16.mxu0 %vm164_vm0, %v698_v2  ;;  %674 = vmatprep.mubr.msk.bf16.mxu1 %vm164_vm0, %v699_v3  ;;  %v707_v11 = vld [vmem:[%s969_s2 + $0x60] sm:$0xff]   ;;  %v709_v13 = vld [vmem:[%s969_s2 + $0x68] sm:$0xff]   ;;  %v710_v14 = vld [vmem:[%s969_s2 + $0x30] sm:$0xff]   ;;  %s576_s18 = sshll.u32 %s757_s17, 4  ;;  %s577_s18 = int_to_ptr.vmem [resolvable:$true] %s576_s18 }
  0x14   :  { %v711_v15 = vld [vmem:[%s969_s2 + $0x70] sm:$0xff]   ;;  %v712_v16 = vld [vmem:[%s969_s2 + $0x38] sm:$0xff]   ;;  %v628_v18 = vld [vmem:[%s968_s1] sm:$0xff]   ;;  %s730_s19 = scalar_lea.vmem %s577_s18, 16  ;;  %s734_s20 = scalar_lea.vmem %s577_s18, 32 }
  0x15   :  { %657 = vmatpush3.bf16.msra.mxu0 %v697_v1  ;;  %693 = vmatpush3.bf16.msra.mxu1 %v697_v1  ;;  %v713_v17 = vld [vmem:[%s969_s2 + $0x78] sm:$0xff]   ;;  %v635_v19 = vld [vmem:[%s968_s1 + $0x8] sm:$0xff]   ;;  %v867_v20 = vunpack.c.l.bf16 %v628_v18  ;;  %v871_v24 = vunpack.c.h.bf16 %v628_v18  ;;  %s914_s1 = sld [smem:[#allocation3]]  ;;  %s916_s2 = sld [smem:[#allocation3 + $0x1]] }
  0x16   :  { %v869_v21 = vunpack.c.l.bf16 %v635_v19  ;;  %v876_v31 = vunpack.c.h.bf16 %v635_v19  ;;  %p731_p5 = scmp.ne.s32.totalorder %s577_s18, %s730_s19  ;;  %p735_p6 = scmp.lt.s32.totalorder %s577_s18, %s577_s18 }
  0x17   :  { %p736_p7 = scmp.lt.s32.totalorder %s734_s20, %s730_s19 }
  0x18   :  { %659 = vmatmul.mubr.msk.bf16.vlgmr.msra.gmra.mrb[0].mxu0 %vm164_vm0, %v700_v4  ;;  %675 = vmatmul.mubr.msk.bf16.vlgmr.msra.gmra.mrb[0].mxu1 %vm164_vm0, %v701_v5 }
  0x19   :  { %662 = vmatprep.mubr.msk.bf16.mxu0 %vm164_vm0, %v702_v6  ;;  %678 = vmatprep.mubr.msk.bf16.mxu1 %vm164_vm0, %v703_v7  ;;  %p737_p8 = por %p736_p7, %p735_p6 }
  0x1b   :  { %p738_p9 = pnand %p737_p8, %p731_p5 }
  0x20   :  { %663 = vmatmul.mubr.msk.bf16.gmra.mrb[4].mxu0 %vm164_vm0, %v704_v8  ;;  %679 = vmatmul.mubr.msk.bf16.gmra.mrb[4].mxu1 %vm164_vm0, %v705_v9 }
  0x21   :  { %666 = vmatprep.mubr.msk.bf16.mxu0 %vm164_vm0, %v706_v10  ;;  %682 = vmatprep.mubr.msk.bf16.mxu1 %vm164_vm0, %v707_v11 }
  0x28   :  { %667 = vmatmul.mubr.msk.bf16.gmra.mrb[8].mxu0 %vm164_vm0, %v708_v12  ;;  %683 = vmatmul.mubr.msk.bf16.gmra.mrb[8].mxu1 %vm164_vm0, %v709_v13 }
  0x29   :  { %670 = vmatprep.mubr.msk.bf16.mxu0 %vm164_vm0, %v710_v14  ;;  %686 = vmatprep.mubr.msk.bf16.mxu1 %vm164_vm0, %v711_v15 }
  0x30   :  { %671 = vmatmul.mubr.msk.bf16.gmra.mrb[12].mxu0 %vm164_vm0, %v712_v16  ;;  %687 = vmatmul.mubr.msk.bf16.gmra.mrb[12].mxu1 %vm164_vm0, %v713_v17 }
  0xeb   :  { %v660_v22 = vpop.f32.mrb[0].mxu0  ;;  %v676_v23 = vpop.f32.mrb[0].mxu1 }
  0xec   :  { %v473_v25 = vmul.f32 %v676_v23, %v869_v21  ;;  %v247_v26 = vpop.f32.mrb[1].mxu0  ;;  %v311_v27 = vpop.f32.mrb[1].mxu1  ;;  %v384_v33 = vmul.f32 %v660_v22, %v869_v21 }
  0xed   :  { %v382_v28 = vmul.f32 %v867_v20, %v247_v26  ;;  %v471_v29 = vmul.f32 %v867_v20, %v311_v27  ;;  %v661_v30 = vpop.f32.mrb[2].mxu0  ;;  %v677_v32 = vpop.f32.mrb[2].mxu1 }
  0xee   :  { %v250_v34 = vpop.f32.mrb[3].mxu0  ;;  %v314_v35 = vpop.f32.mrb[3].mxu1  ;;  %v474_v37 = vmul.f32 %v677_v32, %v876_v31  ;;  %v478_v40 = vsel %vm386_vm1, %v473_v25, 0.0  ;;  %v385_v42 = vmul.f32 %v661_v30, %v876_v31  ;;  %v390_v47 = vsel %vm386_vm1, %v384_v33, 0.0 }
  0xef   :  { %v475_v36 = vsel %vm386_vm1, %v471_v29, 0.0  ;;  %v383_v38 = vmul.f32 %v871_v24, %v250_v34  ;;  %v472_v39 = vmul.f32 %v871_v24, %v314_v35  ;;  %v387_v41 = vsel %vm386_vm1, %v382_v28, 0.0 }
  0xf0   :  { %v480_v48 = vsel %vm386_vm1, %v474_v37, 0.0  ;;  %v392_v55 = vsel %vm386_vm1, %v385_v42, 0.0 }
  0xf1   :  { %v388_v43 = vsel %vm386_vm1, %v383_v38, 0.0  ;;  %v476_v44 = vsel %vm386_vm1, %v472_v39, 0.0 }
  0xf2   :  { %v389_v45 = vadd.f32 %v388_v43, %v387_v41  ;;  %v477_v46 = vadd.f32 %v476_v44, %v475_v36 }
  0xf3   :  { %v664_v49 = vpop.f32.mrb[4].mxu0  ;;  %v680_v50 = vpop.f32.mrb[4].mxu1 }
  0xf4   :  { %v391_v51 = vadd.f32 %v390_v47, %v389_v45  ;;  %v479_v52 = vadd.f32 %v478_v40, %v477_v46  ;;  %v263_v53 = vpop.f32.mrb[5].mxu0  ;;  %v327_v54 = vpop.f32.mrb[5].mxu1  ;;  %v495_v56 = vmul.f32 %v680_v50, %v869_v21  ;;  %v407_v1 = vmul.f32 %v664_v49, %v869_v21 }
  0xf5   :  { %v405_v57 = vmul.f32 %v867_v20, %v263_v53  ;;  %v493_v58 = vmul.f32 %v867_v20, %v327_v54  ;;  %v665_v59 = vpop.f32.mrb[6].mxu0  ;;  %v681_v60 = vpop.f32.mrb[6].mxu1 }
  0xf6   :  { %v393_v61 = vadd.f32 %v392_v55, %v391_v51  ;;  %v894_v62 = vadd.f32 %v480_v48, %v479_v52  ;;  %v266_v63 = vpop.f32.mrb[7].mxu0  ;;  %v330_v0 = vpop.f32.mrb[7].mxu1  ;;  %v496_v4 = vmul.f32 %v681_v60, %v876_v31  ;;  %v500_v7 = vsel %vm386_vm1, %v495_v56, 0.0 }
  0xf7   :  { %v497_v2 = vsel %vm386_vm1, %v493_v58, 0.0  ;;  %v406_v5 = vmul.f32 %v871_v24, %v266_v63  ;;  %v494_v6 = vmul.f32 %v871_v24, %v330_v0  ;;  %v409_v8 = vsel %vm386_vm1, %v405_v57, 0.0 }
  0xf8   :  { %v394_v3 = vrot.slane %v393_v61, 4  ;;  %v408_v10 = vmul.f32 %v665_v59, %v876_v31  ;;  %v412_v18 = vsel %vm386_vm1, %v407_v1, 0.0  ;;  %v502_v19 = vsel %vm386_vm1, %v496_v4, 0.0 }
  0xf9   :  { %v410_v11 = vsel %vm386_vm1, %v406_v5, 0.0  ;;  %v498_v12 = vsel %vm386_vm1, %v494_v6, 0.0  ;;  %v482_v0 = vrot.slane %v894_v62, 4 }
  0xfa   :  { %v395_v9 = vadd.f32 %v394_v3, %v393_v61  ;;  %v411_v13 = vadd.f32 %v410_v11, %v409_v8  ;;  %v499_v14 = vadd.f32 %v498_v12, %v497_v2  ;;  %v414_v32 = vsel %vm386_vm1, %v408_v10, 0.0 }
  0xfb   :  { %v668_v15 = vpop.f32.mrb[8].mxu0  ;;  %v684_v16 = vpop.f32.mrb[8].mxu1  ;;  %v402_v12 = vstv %s914_s1 }
  0xfc   :  { %v396_v17 = vrot.slane %v395_v9, 2  ;;  %v279_v22 = vpop.f32.mrb[9].mxu0  ;;  %v343_v23 = vpop.f32.mrb[9].mxu1  ;;  %v413_v25 = vadd.f32 %v412_v18, %v411_v13  ;;  %v501_v26 = vadd.f32 %v500_v7, %v499_v14  ;;  %v517_v33 = vmul.f32 %v684_v16, %v869_v21 }
  0xfd   :  { %v515_v27 = vmul.f32 %v867_v20, %v343_v23  ;;  %v669_v28 = vpop.f32.mrb[10].mxu0  ;;  %v685_v29 = vpop.f32.mrb[10].mxu1  ;;  %v427_v34 = vmul.f32 %v867_v20, %v279_v22  ;;  %v429_v39 = vmul.f32 %v668_v15, %v869_v21  ;;  %v424_v14 = vstv %s916_s2 }
  0xfe   :  { %v397_v30 = vadd.f32 %v396_v17, %v395_v9  ;;  %v282_v35 = vpop.f32.mrb[11].mxu0  ;;  %v346_v36 = vpop.f32.mrb[11].mxu1  ;;  %v415_v37 = vadd.f32 %v414_v32, %v413_v25  ;;  %v503_v38 = vadd.f32 %v502_v19, %v501_v26  ;;  %v518_v42 = vmul.f32 %v685_v29, %v876_v31 }
  0xff   :  { %v519_v40 = vsel %vm386_vm1, %v515_v27, 0.0  ;;  %v428_v43 = vmul.f32 %v871_v24, %v282_v35  ;;  %v516_v44 = vmul.f32 %v871_v24, %v346_v36  ;;  %v522_v46 = vsel %vm386_vm1, %v517_v33, 0.0 }
 0x100   :  { %v416_v41 = vrot.slane %v415_v37, 4  ;;  %v398_v45 = vrot.slane %v397_v30, 1  ;;  %v431_v47 = vsel %vm386_vm1, %v427_v34, 0.0  ;;  %v430_v49 = vmul.f32 %v669_v28, %v876_v31 }
 0x101   :  { %v432_v50 = vsel %vm386_vm1, %v428_v43, 0.0  ;;  %v520_v51 = vsel %vm386_vm1, %v516_v44, 0.0  ;;  %v434_v59 = vsel %vm386_vm1, %v429_v39, 0.0  ;;  %v524_v60 = vsel %vm386_vm1, %v518_v42, 0.0 }
 0x102   :  { %v417_v48 = vadd.f32 %v416_v41, %v415_v37  ;;  %v433_v54 = vadd.f32 %v432_v50, %v431_v47  ;;  %v521_v55 = vadd.f32 %v520_v51, %v519_v40  ;;  %v504_v1 = vrot.slane %v503_v38, 4 }
 0x103   :  { %v672_v52 = vpop.f32.mrb[12].mxu0  ;;  %v688_v53 = vpop.f32.mrb[12].mxu1  ;;  %v399_v6 = vadd.f32 %v398_v45, %v397_v30  ;;  %v436_v8 = vsel %vm386_vm1, %v430_v49, 0.0  ;;  %v483_v16 = vadd.f32 %v482_v0, %v894_v62 }
 0x104   :  { %v295_v56 = vpop.f32.mrb[13].mxu0  ;;  %v359_v57 = vpop.f32.mrb[13].mxu1  ;;  %v418_v58 = vrot.slane %v417_v48, 2  ;;  %v435_v2 = vadd.f32 %v434_v59, %v433_v54  ;;  %v523_v3 = vadd.f32 %v522_v46, %v521_v55  ;;  %v539_v15 = vmul.f32 %v688_v53, %v869_v21 }
 0x105   :  { %v673_v61 = vpop.f32.mrb[14].mxu0  ;;  %v689_v63 = vpop.f32.mrb[14].mxu1  ;;  %v537_v11 = vmul.f32 %v867_v20, %v359_v57  ;;  %v505_v17 = vadd.f32 %v504_v1, %v503_v38  ;;  %v449_v19 = vmul.f32 %v867_v20, %v295_v56  ;;  %v400_v22 = vmax.f32 %v399_v6, 0.0 }
 0x106   :  { %v298_v4 = vpop.f32.mrb[15].mxu0  ;;  %v362_v5 = vpop.f32.mrb[15].mxu1  ;;  %v419_v7 = vadd.f32 %v418_v58, %v417_v48  ;;  %v437_v9 = vadd.f32 %v436_v8, %v435_v2  ;;  %v525_v10 = vadd.f32 %v524_v60, %v523_v3  ;;  %v451_v25 = vmul.f32 %v672_v52, %v869_v21 }
 0x107   :  { %v540_v26 = vmul.f32 %v689_v63, %v876_v31  ;;  %v541_v28 = vsel %vm386_vm1, %v537_v11, 0.0  ;;  %v450_v29 = vmul.f32 %v871_v24, %v298_v4  ;;  %v538_v30 = vmul.f32 %v871_v24, %v362_v5 }
 0x108   :  { %v420_v13 = vrot.slane %v419_v7, 1  ;;  %v438_v18 = vrot.slane %v437_v9, 4  ;;  %v526_v32 = vrot.slane %v525_v10, 4  ;;  %v544_v33 = vsel %vm386_vm1, %v539_v15, 0.0 }
 0x109   :  { %v452_v20 = vmul.f32 %v673_v61, %v876_v31  ;;  %v453_v21 = vsel %vm386_vm1, %v449_v19, 0.0  ;;  %v454_v35 = vsel %vm386_vm1, %v450_v29, 0.0  ;;  %v542_v36 = vsel %vm386_vm1, %v538_v30, 0.0 }
 0x10a   :  { %v421_v23 = vadd.f32 %v420_v13, %v419_v7  ;;  %v439_v27 = vadd.f32 %v438_v18, %v437_v9  ;;  %v403_v37 = vmul.f32 %v402_v12, %v400_v22  ;;  %v455_v39 = vadd.f32 %v454_v35, %v453_v21 }
 0x10b   :  { %v543_v40 = vadd.f32 %v542_v36, %v541_v28  ;;  %v484_v41 = vrot.slane %v483_v16, 2  ;;  %v456_v42 = vsel %vm386_vm1, %v451_v25, 0.0  ;;  %v546_v43 = vsel %vm386_vm1, %v540_v26, 0.0 }
 0x10c   :  { %v422_v62 = vmax.f32 %v421_v23, 0.0  ;;  %v440_v34 = vrot.slane %v439_v27, 2  ;;  %v527_v31 = vadd.f32 %v526_v32, %v525_v10  ;;  %v457_v45 = vadd.f32 %v456_v42, %v455_v39 }
 0x10d   :  { %v545_v46 = vadd.f32 %v544_v33, %v543_v40  ;;  %v458_v48 = vsel %vm386_vm1, %v452_v20, 0.0  ;;  %v506_v49 = vrot.slane %v505_v17, 2  ;;  %v446_v53 = vstv %s938_s9 }
 0x10e   :  { %v425_v38 = vmul.f32 %v424_v14, %v422_v62  ;;  %v441_v24 = vadd.f32 %v440_v34, %v439_v27  ;;  %v459_v50 = vadd.f32 %v458_v48, %v457_v45  ;;  %v485_v54 = vadd.f32 %v484_v41, %v483_v16 }
 0x10f   :  { %v547_v51 = vadd.f32 %v546_v43, %v545_v46  ;;  %v528_v55 = vrot.slane %v527_v31, 2  ;;  %v507_v59 = vadd.f32 %v506_v49, %v505_v17  ;;  %v468_v14 = vstv %s621_s10 }
 0x110   :  { %v426_v44 = vadd.f32 %v425_v38, %v403_v37  ;;  %v442_v47 = vrot.slane %v441_v24, 1  ;;  %v460_v56 = vrot.slane %v459_v50, 4  ;;  %v486_v0 = vrot.slane %v485_v54, 1 }
 0x111   :  { %v548_v57 = vrot.slane %v547_v51, 4  ;;  %v529_v1 = vadd.f32 %v528_v55, %v527_v31  ;;  %v508_v5 = vrot.slane %v507_v59, 1  ;;  %v490_v18 = vstv %s622_s11 }
 0x112   :  { %v443_v52 = vadd.f32 %v442_v47, %v441_v24  ;;  %v461_v60 = vadd.f32 %v460_v56, %v459_v50  ;;  %v487_v8 = vadd.f32 %v486_v0, %v485_v54  ;;  %v512_v25 = vstv %s623_s12 }
 0x113   :  { %v549_v61 = vadd.f32 %v548_v57, %v547_v51  ;;  %v530_v9 = vrot.slane %v529_v1, 1  ;;  %v509_v11 = vadd.f32 %v508_v5, %v507_v59  ;;  %v534_v29 = vstv %s624_s13 }
 0x114   :  { %v444_v58 = vmax.f32 %v443_v52, 0.0  ;;  %v462_v2 = vrot.slane %v461_v60, 2  ;;  %v488_v15 = vmax.f32 %v487_v8, 0.0  ;;  %v556_v33 = vstv %s625_s14 }
 0x115   :  { %v550_v3 = vrot.slane %v549_v61, 2  ;;  %v531_v16 = vadd.f32 %v530_v9, %v529_v1  ;;  %v510_v19 = vmax.f32 %v509_v11, 0.0  ;;  %v560_v36 = vstv %s971_s4 }
 0x116   :  { %v447_v63 = vmul.f32 %v446_v53, %v444_v58  ;;  %v463_v6 = vadd.f32 %v462_v2, %v461_v60  ;;  %v491_v26 = vmul.f32 %v490_v18, %v488_v15 }
 0x117   :  { %v551_v7 = vadd.f32 %v550_v3, %v549_v61  ;;  %v532_v27 = vmax.f32 %v531_v16, 0.0  ;;  %v513_v30 = vmul.f32 %v512_v25, %v510_v19 }
 0x118   :  { %v448_v4 = vadd.f32 %v447_v63, %v426_v44  ;;  %v464_v10 = vrot.slane %v463_v6, 1 }
 0x119   :  { %v552_v13 = vrot.slane %v551_v7, 1  ;;  %v535_v20 = vmul.f32 %v534_v29, %v532_v27 }
 0x11a   :  { %v465_v12 = vadd.f32 %v464_v10, %v463_v6 }
 0x11b   :  { %v553_v23 = vadd.f32 %v552_v13, %v551_v7 }
 0x11c   :  { %v466_v17 = vmax.f32 %v465_v12, 0.0 }
 0x11d   :  { %v554_v32 = vmax.f32 %v553_v23, 0.0 }
 0x11e   :  { %v469_v22 = vmul.f32 %v468_v14, %v466_v17 }
 0x11f   :  { %v557_v21 = vmul.f32 %v556_v33, %v554_v32 }
 0x120   :  { %v470_v28 = vadd.f32 %v469_v22, %v448_v4 }
 0x122   :  { %v492_v62 = vadd.f32 %v491_v26, %v470_v28 }
 0x124   :  { %v514_v34 = vadd.f32 %v513_v30, %v492_v62 }
 0x126   :  { %v536_v35 = vadd.f32 %v535_v20, %v514_v34 }
 0x128   :  { %v558_v37 = vadd.f32 %v557_v21, %v536_v35 }
 0x12a   :  { %v561_v38 = vadd.f32 %v560_v36, %v558_v37 }
 0x12c   :  { %v626_v39 = vmul.f32 -1.442695, %v561_v38 }
 0x12e   :  { %714 = vpow2.f32 %v626_v39 }
 0x138   :  { %v715_v40 = vpop.eup %714 }
 0x139   :  { %v565_v41 = vadd.f32 1.0, %v715_v40 }
 0x13b   :  { %716 = vrcp.f32 %v565_v41 }
 0x145   :  { %v717_v24 = vpop.eup %716 }
 0x146   :  { %569 = vst.msk [vmem:[#allocation6] sm:$0x1] %vm568_vm2, %v717_v24 }
 0x147   :  { %741 = shalt.err (!%p738_p9)
}
 0x148   :  { %s742_s22 = scalar_lea.hbm %s972_s5, 16 }
 0x149   :  { %p743_p10 = scmp.ne.s32.totalorder %s972_s5, %s742_s22  ;;  %p746_p11 = scmp.lt.u32.totalorder %s742_s22, %s972_s5 }
 0x14b   :  { %p748_p12 = pnand %p746_p11, %p743_p10 }
 0x14d   :  { %751 = shalt.err (!%p748_p12)
}
 0x14e   :  { %579 = dma.vmem_to_hbm [thread:$0]  %s577_s18, 16, %s972_s5, [#allocation4]  }
 0x14f   :  { %754 = dma.done.wait [#allocation4], 16  }
 0x150   :  { %755 = vsyncadd [#allocation4], 4294967280 }
 0x151   :  { %583 = vsyncpa [#allocation4], 1 }
 0x152   :  { %584 = vsyncpa [#allocation5], 1 }

</bundles_post_ra>
